<compile_context>
chip_gen: v7x
topology: tpu7x:2x2x1
jax: 0.10.0
libtpu: 0.0.40
codegen_flags: <defaults>
</compile_context>

<pallas_src>
import functools
import math

import jax
import jax.numpy as jnp
from jax.experimental import pallas as pl
from jax.experimental.pallas import tpu as pltpu


def _build_pe(d_model: int, max_len: int = 5000) -> jnp.ndarray:
    """Deterministic sinusoidal table, shape (max_len, 1, d_model), float32."""
    position = jnp.arange(0, max_len, dtype=jnp.float32)[:, None]          # (L, 1)
    div_term = jnp.exp(
        jnp.arange(0, d_model, 2, dtype=jnp.float32)
        * (-math.log(10000.0) / d_model)
    )                                                                       # (D/2,)
    pe = jnp.zeros((max_len, d_model), dtype=jnp.float32)
    pe = pe.at[:, 0::2].set(jnp.sin(position * div_term))
    pe = pe.at[:, 1::2].set(jnp.cos(position * div_term))
    return pe[:, None, :]                                                   # (L, 1, D)


def _pe_add_kernel(x_ref, pe_ref, o_ref, *, batch: int):
    # x_ref:  (tS, B*D) lane-dense tile in VMEM
    # pe_ref: (tS, D)   tile in VMEM -> tiled across the batch axis in lanes
    x = x_ref[...]
    p = pe_ref[...]
    if batch > 1:
        # Replicate the per-position encoding once per batch element along the
        # lane axis so it matches the flattened (B, D) -> B*D layout of x.
        p = jnp.concatenate([p] * batch, axis=-1)
    o_ref[...] = (x + p).astype(o_ref.dtype)


def positional_encoding_forward(x: jnp.ndarray, pe: jnp.ndarray) -> jnp.ndarray:
    """x: (S, B, D);  pe: (max_len, 1, D).  Returns x + pe[:S] with x's dtype."""
    S, B, D = x.shape
    max_len = pe.shape[0]
    assert S <= max_len, f"sequence length {S} exceeds positional table {max_len}"
    assert pe.shape == (max_len, 1, D), "pe buffer shape mismatch"

    # Lane-dense view: collapse (B, D) into one contiguous lane axis (free reshape).
    x2 = x.reshape(S, B * D)
    pe2 = pe.reshape(max_len, D)

    # Pick the largest S-tile whose double-buffered working set
    #   2 x (x tile) + 2 x (out tile) + 2 x (pe tile)
    # stays well under the scoped-VMEM limit we request (conservative for v7x's
    # 64 MiB total VMEM and v5e's smaller default).
    vmem_budget = 16 * 1024 * 1024
    x_itemsize = jnp.dtype(x.dtype).itemsize
    pe_itemsize = jnp.dtype(pe.dtype).itemsize
    row_bytes = 4 * B * D * x_itemsize + 2 * D * pe_itemsize
    rows_fit = max(1, vmem_budget // row_bytes)
    t_s = min(S, rows_fit)
    t_s = max(8, (t_s // 8) * 8)  # multiple of 8: legal sublane tiling for x and pe

    grid = (pl.cdiv(S, t_s),)

    out2 = pl.pallas_call(
        functools.partial(_pe_add_kernel, batch=B),
        out_shape=jax.ShapeDtypeStruct((S, B * D), x.dtype),
        grid_spec=pltpu.PrefetchScalarGridSpec(
            num_scalar_prefetch=0,
            grid=grid,
            in_specs=[
                pl.BlockSpec((t_s, B * D), lambda i: (i, 0)),   # x tile
                pl.BlockSpec((t_s, D), lambda i: (i, 0)),       # pe rows (full table passed)
            ],
            out_specs=pl.BlockSpec((t_s, B * D), lambda i: (i, 0)),
        ),
        compiler_params=pltpu.CompilerParams(
            dimension_semantics=("parallel",),      # independent S tiles; v7x 2-TC sharding
            vmem_limit_bytes=32 * 1024 * 1024,
        ),
    )(x2, pe2)

    return out2.reshape(S, B, D)


if __name__ == "__main__":
    # Small shapes consistent with the module: seq=8, batch=2, d_model=32.
    S, B, D = 8, 2, 32
    max_len = 5000  # module default

    key = jax.random.PRNGKey(0)
    x = jax.random.normal(key, (S, B, D), dtype=jnp.float32)

    pe = _build_pe(D, max_len)  # deterministic "buffer", no checkpoint load

    out = positional_encoding_forward(x, pe)
    out = jax.block_until_ready(out)

    # Reference check in plain JAX (same semantics as the PyTorch forward).
    ref = x + pe[:S]
    assert out.shape == (S, B, D)
    assert out.dtype == x.dtype
    assert jnp.allclose(out, ref, atol=1e-6, rtol=1e-6)

    print("KERNEL_OK")
</pallas_src>

<mosaic_0001>
module attributes {stable_mosaic.version = 11 : i64} {
  func.func @_pe_add_kernel(%arg0: i32, %arg1: memref<8x64xf32, #tpu.memory_space<vmem>>, %arg2: memref<8x32xf32, #tpu.memory_space<vmem>>, %arg3: memref<8x64xf32, #tpu.memory_space<vmem>>) attributes {dimension_semantics = [#tpu.dimension_semantics<parallel>], iteration_bounds = array<i64: 1>, scalar_prefetch = 0 : i64, scratch_operands = 0 : i64, tpu.core_type = #tpu.core_type<tc>, window_params = [{transform_indices = @transform_0, window_bounds = array<i64: 8, 64>}, {transform_indices = @transform_1, window_bounds = array<i64: 8, 32>}, {transform_indices = @transform_2, window_bounds = array<i64: 8, 64>}]} {
    %c0 = arith.constant 0 : index
    %c0_0 = arith.constant 0 : index
    %0 = vector.load %arg1[%c0, %c0_0] : memref<8x64xf32, #tpu.memory_space<vmem>>, vector<8x64xf32>
    %c0_1 = arith.constant 0 : index
    %c0_2 = arith.constant 0 : index
    %1 = vector.load %arg2[%c0_1, %c0_2] : memref<8x32xf32, #tpu.memory_space<vmem>>, vector<8x32xf32>
    %2 = tpu.concatenate %1, %1 in 1 : vector<8x32xf32>, vector<8x32xf32> -> vector<8x64xf32>
    %3 = arith.addf %0, %2 : vector<8x64xf32>
    %c0_3 = arith.constant 0 : index
    %c0_4 = arith.constant 0 : index
    %4 = vector.load %arg3[%c0_3, %c0_4] : memref<8x64xf32, #tpu.memory_space<vmem>>, vector<8x64xf32>
    tpu.vector_store %arg3[%c0_3, %c0_4], %3 {strides = array<i32>} : memref<8x64xf32, #tpu.memory_space<vmem>>, vector<8x64xf32>,
    return
  }
  func.func @transform_0(%arg0: i32) -> (i32, i32) {
    %c0_i32 = arith.constant 0 : i32
    %c0_i32_0 = arith.constant 0 : i32
    return %arg0, %c0_i32 : i32, i32
  }
  func.func @transform_1(%arg0: i32) -> (i32, i32) {
    %c0_i32 = arith.constant 0 : i32
    %c0_i32_0 = arith.constant 0 : i32
    return %arg0, %c0_i32 : i32, i32
  }
  func.func @transform_2(%arg0: i32) -> (i32, i32) {
    %c0_i32 = arith.constant 0 : i32
    %c0_i32_0 = arith.constant 0 : i32
    return %arg0, %c0_i32 : i32, i32
  }
}

</mosaic_0001>

<bundles_post_ra>
// kernel: tpu_custom_call.1
= control target key start
LH: loop header
LB: loop body
LE: loop exit
PB: predicated region body
PF: predicated region fallthrough
CT: control target
= control target key end

     0   :  { %s98_s0 = inlined_call_operand.vmem [shape: f32[8,64], index: 0, kind: input, shape index: {}]   ;;  %s99_s1 = inlined_call_operand.vmem [shape: f32[5000,32], index: 1, kind: input, shape index: {}]   ;;  %s100_s2 = inlined_call_operand.hbm [shape: f32[8,64], index: 2, kind: output, shape index: {}]  }
   0x1   :  { %v13_v0 = vld [vmem:[%s99_s1] sm:$0xff] }
   0x2   :  { %7 = vsyncpa [#allocation3], 0  ;;  %s63_s11 = smov 32   ;;  %vm18_vm0 = vcmask 261120   ;;  %v12_v1 = vld [vmem:[%s98_s0] sm:$0xff]  ;;  %s64_s14 = smov [#allocation2]  }
   0x3   :  { %15 = vrot.lane.b32.xlu0 %v13_v0, %s63_s11  ;;  %s29_s15 = sshll.u32 %s64_s14, 4  ;;  %vm21_vm1 = vcmask 523264   ;;  %s30_s15 = int_to_ptr.vmem [resolvable:$true] %s29_s15 }
   0x4   :  { %s39_s16 = scalar_lea.vmem %s30_s15, 128  ;;  %p44_p1 = scmp.lt.s32.totalorder %s30_s15, %s30_s15 }
   0x5   :  { %p40_p0 = scmp.ne.s32.totalorder %s30_s15, %s39_s16  ;;  %p45_p2 = scmp.lt.s32.totalorder %s39_s16, %s39_s16 }
   0x7   :  { %p46_p3 = por %p45_p2, %p44_p1 }
   0x9   :  { %p47_p4 = pnand %p46_p3, %p40_p0 }
  0x75   :  { %v16_v2 = vpop.permute.xlu0 %15 }
  0x76   :  { %v19_v3 = vsel %vm18_vm0, %v13_v0, %v16_v2 }
  0x77   :  { %v20_v4 = vadd.f32 %v19_v3, %v12_v1 }
  0x79   :  { %22 = vst.msk [vmem:[#allocation2] sm:$0xff] %vm21_vm1, %v20_v4 }
  0x7a   :  { %50 = shalt.err (!%p47_p4)
}
  0x7b   :  { %s51_s18 = scalar_lea.hbm %s100_s2, 128 }
  0x7c   :  { %p52_p5 = scmp.ne.s32.totalorder %s100_s2, %s51_s18  ;;  %p55_p6 = scmp.lt.u32.totalorder %s51_s18, %s100_s2 }
  0x7e   :  { %p57_p7 = pnand %p55_p6, %p52_p5 }
  0x80   :  { %60 = shalt.err (!%p57_p7)
}
  0x81   :  { %32 = dma.vmem_to_hbm [thread:$0]  %s30_s15, 128, %s100_s2, [#allocation3]  }
  0x82   :  { %61 = dma.done.wait [#allocation3], 128  }
  0x83   :  { %62 = vsyncadd [#allocation3], 4294967168 }
  0x84   :  { %36 = vsyncpa [#allocation3], 1 }

</bundles_post_ra>
